<compile_context>
chip_gen: v6e
topology: v6e:2x2x1
jax: 0.10.0
libtpu: 0.0.40
codegen_flags: <defaults>
</compile_context>

<pallas_src>
import functools
import math

import jax
import jax.numpy as jnp
from jax.experimental import pallas as pl


LANE = 128  # common 128-lane alignment (works on v5e/v6e/v7x MXUs)


# ---------------------------------------------------------------------------
# Fused transformer-layer + head kernel (single invocation, no grid)
# ---------------------------------------------------------------------------

def _fused_forward_kernel(h_ref, hcls_ref, wqkv_ref, bqkv_ref, wo_ref, bo_ref,
                          ln1g_ref, ln1b_ref, w1_ref, b1_ref, w2_ref, b2_ref,
                          ln2g_ref, ln2b_ref, hw_ref, hb_ref, o_ref,
                          *, batch, seq, head_mode):
    """Whole forward for all B*S tokens in one step; everything stays in VMEM."""
    f32 = jnp.float32
    bf16 = jnp.bfloat16

    def layernorm(x, g_ref, b_ref):
        mu = jnp.mean(x, axis=-1, keepdims=True)
        var = jnp.mean(jnp.square(x - mu), axis=-1, keepdims=True)
        return (x - mu) * jax.lax.rsqrt(var + 1e-5) * g_ref[...] + b_ref[...]

    x0 = h_ref[...]                                                      # [B*S, H] bf16

    # --- fused QKV projection: one lane-dense [B*S, 3*128] bf16 matmul ------
    # (wq / bq already carry the 1/sqrt(H) attention scale, folded at pack time)
    qkv = jnp.dot(x0, wqkv_ref[...], preferred_element_type=f32)
    qkv = qkv + bqkv_ref[...]                                            # [B*S, 384] f32
    q = qkv[:, 0:LANE].reshape(batch, seq, LANE)
    k = qkv[:, LANE:2 * LANE].reshape(batch, seq, LANE)
    v = qkv[:, 2 * LANE:3 * LANE].reshape(batch, seq, LANE)

    if head_mode == "sequence":
        # Only token 0 of each sequence is consumed downstream: compute its
        # queries only, and carry its residual input ([B, H]).
        q = q[:, 0:1, :]
        x_res = hcls_ref[...].astype(f32)                                # [B, H]
    else:
        x_res = x0.astype(f32)                                           # [B*S, H]

    # --- batched softmax attention (padded lanes are zero -> exact dots) ----
    s = jnp.einsum("bqd,bkd->bqk", q.astype(bf16), k.astype(bf16),
                   preferred_element_type=f32)
    s = s - jnp.max(s, axis=-1, keepdims=True)
    p = jnp.exp(s)
    p = p / jnp.sum(p, axis=-1, keepdims=True)
    ctx = jnp.einsum("bqk,bkd->bqd", p.astype(bf16), v.astype(bf16),
                     preferred_element_type=f32)
    rows = ctx.shape[0] * ctx.shape[1]
    ctx2 = ctx.reshape(rows, LANE)                                       # [rows, 128]

    attn = jnp.dot(ctx2.astype(bf16), wo_ref[...], preferred_element_type=f32)
    attn = attn + bo_ref[...]                                            # [rows, H]
    x1 = layernorm(x_res + attn, ln1g_ref, ln1b_ref)

    # --- FFN (intermediate padded to 128 lanes; zero cols/rows are inert) ---
    f = jnp.dot(x1.astype(bf16), w1_ref[...], preferred_element_type=f32)
    f = jax.nn.gelu(f + b1_ref[...])
    y = jnp.dot(f.astype(bf16), w2_ref[...], preferred_element_type=f32)
    y = y + b2_ref[...]
    x2 = layernorm(x1 + y, ln2g_ref, ln2b_ref)

    # --- head matmul (lane-dense padded output, sliced by the wrapper) ------
    logits = jnp.dot(x2.astype(bf16), hw_ref[...], preferred_element_type=f32)
    logits = logits + hb_ref[...]
    o_ref[...] = logits.astype(o_ref.dtype)


def _fused_forward(h2d, h_cls, packed, head_w, head_b, *, batch, seq, head_mode):
    """h2d: [B*S, H] bf16 embeddings; h_cls: [B, H] token-0 embeddings.

    token head    -> [B*S, Vp] f32   (Vp = vocab padded to 128)
    sequence head -> [B, Np]  f32    (Np = num_labels padded to 128)
    """
    rows_out = batch * seq if head_mode == "token" else batch
    vp = head_w.shape[1]
    kern = functools.partial(_fused_forward_kernel,
                             batch=batch, seq=seq, head_mode=head_mode)
    # Single grid step: whole arrays live in VMEM for the whole kernel
    # (default no-grid full-array blocks); no per-step overhead, no duplicate
    # weight DMAs.  Total footprint here is <1 MiB, far under every chip's
    # scoped-VMEM default.
    # TODO(synk): at realistic vocab/H/FFN sizes, tile the head matmul over a
    # vocab grid axis (Buffered BlockSpecs) instead of keeping it resident,
    # and fuse the embedding gather via PrefetchScalarGridSpec row gather.
    return pl.pallas_call(
        kern,
        out_shape=jax.ShapeDtypeStruct((rows_out, vp), jnp.float32),
    )(h2d, h_cls, packed["wqkv"], packed["bqkv"], packed["wo"], packed["bo"],
      packed["ln1_g"], packed["ln1_b"], packed["w1"], packed["b1"],
      packed["w2"], packed["b2"], packed["ln2_g"], packed["ln2_b"],
      head_w, head_b)


# ---------------------------------------------------------------------------
# One-time parameter packing (runs at module construction, NOT per forward)
# ---------------------------------------------------------------------------

def _pad_cols(w, total):
    return jnp.pad(w, ((0, 0), (0, total - w.shape[1])))


def _pad_rows(w, total):
    return jnp.pad(w, ((0, total - w.shape[0]), (0, 0)))


def _pack_body(body):
    """Lane-dense (128-aligned) bf16 weight slabs + f32 biases/LN params.

    Padded lanes/rows are zero so the padded matmuls stay exact.  The
    1/sqrt(H) attention scale is folded into wq / bq here (one-time cost).
    """
    H = body["wq"].shape[0]
    scale = 1.0 / math.sqrt(H)
    bf16 = jnp.bfloat16
    wqkv = jnp.concatenate([_pad_cols(body["wq"] * scale, LANE),
                            _pad_cols(body["wk"], LANE),
                            _pad_cols(body["wv"], LANE)], axis=1)        # [H, 384]
    bqkv = jnp.concatenate([_pad_cols((body["bq"] * scale).reshape(1, -1), LANE),
                            _pad_cols(body["bk"].reshape(1, -1), LANE),
                            _pad_cols(body["bv"].reshape(1, -1), LANE)], axis=1)
    return {
        "wqkv": wqkv.astype(bf16), "bqkv": bqkv.astype(jnp.float32),
        "wo": _pad_rows(body["wo"], LANE).astype(bf16),                  # [128, H]
        "bo": body["bo"].reshape(1, -1).astype(jnp.float32),
        "ln1_g": body["ln1_g"].reshape(1, -1).astype(jnp.float32),
        "ln1_b": body["ln1_b"].reshape(1, -1).astype(jnp.float32),
        "w1": _pad_cols(body["w1"], LANE).astype(bf16),                  # [H, 128]
        "b1": _pad_cols(body["b1"].reshape(1, -1), LANE).astype(jnp.float32),
        "w2": _pad_rows(body["w2"], LANE).astype(bf16),                  # [128, H]
        "b2": body["b2"].reshape(1, -1).astype(jnp.float32),
        "ln2_g": body["ln2_g"].reshape(1, -1).astype(jnp.float32),
        "ln2_b": body["ln2_b"].reshape(1, -1).astype(jnp.float32),
    }


def _pack_head(head):
    w, b = head["w"], head["b"]
    n_out = w.shape[1]
    n_pad = pl.cdiv(n_out, LANE) * LANE
    return (_pad_cols(w, n_pad).astype(jnp.bfloat16),
            _pad_cols(b.reshape(1, -1), n_pad).astype(jnp.float32),
            n_out)


# ---------------------------------------------------------------------------
# Jitted per-head forward: embedding gather + fused kernel + output slice
# ---------------------------------------------------------------------------

@functools.partial(jax.jit, static_argnames=("head_mode", "n_out"))
def _forward_impl(emb, packed, head_w, head_b, input_ids, *, head_mode, n_out):
    B, S = input_ids.shape
    # Embedding gather is data-dependent -> plain-JAX glue, but fused into the
    # same jit as the pallas_call so it costs one dispatch, not several.
    h = jnp.take(emb, input_ids, axis=0)                                 # [B, S, H] bf16
    h2d = h.reshape(B * S, -1)
    h_cls = h[:, 0, :]                                                   # [B, H]
    out = _fused_forward(h2d, h_cls, packed, head_w, head_b,
                         batch=B, seq=S, head_mode=head_mode)
    if head_mode == "token":
        return out.reshape(B, S, -1)[..., :n_out]                        # [B, S, V]
    return out[:, :n_out]                                                # [B, num_labels]


class PallasLangModule:
    """Pallas analogue of LangModule: shared body slabs + per-objective heads."""

    def __init__(self, params):
        # Shared body packed ONCE; every head closes over the SAME arrays —
        # the functional analogue of LangModule._partially_merge_models.
        self._emb = params["body"]["emb"].astype(jnp.bfloat16)
        self._packed_body = _pack_body(params["body"])
        self._heads = {}
        for oid, head in params["heads"].items():
            hw, hb, n_out = _pack_head(head)
            self._heads[oid] = (head["type"], hw, hb, n_out)

    def forward(self, **inputs):
        """Mirrors LangModule.forward: select head by `oid`, return raw logits."""
        oid = str(inputs["oid"])
        if oid not in self._heads:
            raise ValueError(
                "Requesting inference with the objective having no registered head.")
        head_mode, hw, hb, n_out = self._heads[oid]
        # TODO(synk): inspect-based filtering of model-specific kwargs has no
        # Pallas equivalent; only `input_ids` is consumed here.
        input_ids = inputs["input_ids"]
        return _forward_impl(self._emb, self._packed_body, hw, hb, input_ids,
                             head_mode=head_mode, n_out=n_out)


# ---------------------------------------------------------------------------
# Parameters (deterministic init) — shared body + per-objective heads
# ---------------------------------------------------------------------------

def init_params(key, vocab=128, hidden=32, ffn=64, num_labels=4):
    ks = jax.random.split(key, 12)
    n = lambda k, shape: (0.02 * jax.random.normal(k, shape)).astype(jnp.float32)
    body = {
        "emb": n(ks[0], (vocab, hidden)),
        "wq": n(ks[1], (hidden, hidden)), "bq": jnp.zeros((hidden,), jnp.float32),
        "wk": n(ks[2], (hidden, hidden)), "bk": jnp.zeros((hidden,), jnp.float32),
        "wv": n(ks[3], (hidden, hidden)), "bv": jnp.zeros((hidden,), jnp.float32),
        "wo": n(ks[4], (hidden, hidden)), "bo": jnp.zeros((hidden,), jnp.float32),
        "ln1_g": jnp.ones((hidden,), jnp.float32), "ln1_b": jnp.zeros((hidden,), jnp.float32),
        "w1": n(ks[5], (hidden, ffn)), "b1": jnp.zeros((ffn,), jnp.float32),
        "w2": n(ks[6], (ffn, hidden)), "b2": jnp.zeros((hidden,), jnp.float32),
        "ln2_g": jnp.ones((hidden,), jnp.float32), "ln2_b": jnp.zeros((hidden,), jnp.float32),
    }
    heads = {
        # token-level head (MLM / token classification): logits over vocab
        "mlm": {"type": "token",
                "w": n(ks[7], (hidden, vocab)),
                "b": jnp.zeros((vocab,), jnp.float32)},
        # sequence classification head: logits over num_labels
        "seq_cls": {"type": "sequence",
                    "w": n(ks[8], (hidden, num_labels)),
                    "b": jnp.zeros((num_labels,), jnp.float32)},
    }
    return {"body": body, "heads": heads}


# ---------------------------------------------------------------------------
# Pure-JAX f32 reference (for correctness check)
# ---------------------------------------------------------------------------

def _ref_forward(params, oid, input_ids):
    body = params["body"]
    B, S = input_ids.shape
    H = body["emb"].shape[1]
    ln = lambda x, g, b: (x - x.mean(-1, keepdims=True)) * jax.lax.rsqrt(
        ((x - x.mean(-1, keepdims=True)) ** 2).mean(-1, keepdims=True) + 1e-5) * g + b
    h = jnp.take(body["emb"], input_ids, axis=0).reshape(B * S, H)
    q = (h @ body["wq"] + body["bq"]).reshape(B, S, H)
    k = (h @ body["wk"] + body["bk"]).reshape(B, S, H)
    v = (h @ body["wv"] + body["bv"]).reshape(B, S, H)
    s = jnp.einsum("bsh,bth->bst", q, k) / math.sqrt(H)
    p = jax.nn.softmax(s, axis=-1)
    ctx = jnp.einsum("bst,bth->bsh", p, v).reshape(B * S, H)
    x = ln(h + ctx @ body["wo"] + body["bo"], body["ln1_g"], body["ln1_b"])
    f = jax.nn.gelu(x @ body["w1"] + body["b1"]) @ body["w2"] + body["b2"]
    x = ln(x + f, body["ln2_g"], body["ln2_b"])
    head = params["heads"][oid]
    if head["type"] == "token":
        return (x @ head["w"] + head["b"]).reshape(B, S, -1)
    pooled = x.reshape(B, S, H)[:, 0, :]
    return pooled @ head["w"] + head["b"]


# ---------------------------------------------------------------------------
# main
# ---------------------------------------------------------------------------

if __name__ == "__main__":
    key = jax.random.PRNGKey(0)
    pkey, dkey = jax.random.split(key)

    VOCAB, HIDDEN, FFN, NUM_LABELS = 128, 32, 64, 4
    B, S = 2, 8

    params = init_params(pkey, vocab=VOCAB, hidden=HIDDEN, ffn=FFN,
                         num_labels=NUM_LABELS)
    module = PallasLangModule(params)          # packing happens ONCE, here
    input_ids = jax.random.randint(dkey, (B, S), 0, VOCAB, dtype=jnp.int32)

    # Head 1: token-level (MLM-style) logits
    logits_mlm = jax.block_until_ready(module.forward(oid="mlm", input_ids=input_ids))
    # Head 2: sequence classification logits
    logits_cls = jax.block_until_ready(module.forward(oid="seq_cls", input_ids=input_ids))

    assert logits_mlm.shape == (B, S, VOCAB), logits_mlm.shape
    assert logits_cls.shape == (B, NUM_LABELS), logits_cls.shape

    # Unknown oid raises, mirroring LangModule.forward.
    try:
        module.forward(oid="bogus", input_ids=input_ids)
        raise AssertionError("expected ValueError for unknown oid")
    except ValueError:
        pass

    ref_mlm = _ref_forward(params, "mlm", input_ids)
    ref_cls = _ref_forward(params, "seq_cls", input_ids)
    # Kernel uses bf16 weight slabs / bf16 MXU operands (f32 accumulation),
    # reference is pure f32 -> tolerance is loosened accordingly.
    err_mlm = float(jnp.max(jnp.abs(logits_mlm - ref_mlm)))
    err_cls = float(jnp.max(jnp.abs(logits_cls - ref_cls)))
    assert jnp.allclose(logits_mlm, ref_mlm, atol=2e-2, rtol=2e-2), err_mlm
    assert jnp.allclose(logits_cls, ref_cls, atol=2e-2, rtol=2e-2), err_cls

    print("KERNEL_OK")
</pallas_src>

<mosaic_0001>
module attributes {stable_mosaic.version = 11 : i64} {
  func.func @_fused_forward_kernel(%arg0: memref<16x32xbf16, #tpu.memory_space<vmem>>, %arg1: memref<2x32xbf16, #tpu.memory_space<vmem>>, %arg2: memref<32x384xbf16, #tpu.memory_space<vmem>>, %arg3: memref<1x384xf32, #tpu.memory_space<vmem>>, %arg4: memref<128x32xbf16, #tpu.memory_space<vmem>>, %arg5: memref<1x32xf32, #tpu.memory_space<vmem>>, %arg6: memref<1x32xf32, #tpu.memory_space<vmem>>, %arg7: memref<1x32xf32, #tpu.memory_space<vmem>>, %arg8: memref<32x128xbf16, #tpu.memory_space<vmem>>, %arg9: memref<1x128xf32, #tpu.memory_space<vmem>>, %arg10: memref<128x32xbf16, #tpu.memory_space<vmem>>, %arg11: memref<1x32xf32, #tpu.memory_space<vmem>>, %arg12: memref<1x32xf32, #tpu.memory_space<vmem>>, %arg13: memref<1x32xf32, #tpu.memory_space<vmem>>, %arg14: memref<32x128xbf16, #tpu.memory_space<vmem>>, %arg15: memref<1x128xf32, #tpu.memory_space<vmem>>, %arg16: memref<16x128xf32, #tpu.memory_space<vmem>>) attributes {dimension_semantics = [], scalar_prefetch = 0 : i64, scratch_operands = 0 : i64, tpu.core_type = #tpu.core_type<tc>} {
    %c0 = arith.constant 0 : index
    %c0_0 = arith.constant 0 : index
    %0 = vector.load %arg0[%c0, %c0_0] : memref<16x32xbf16, #tpu.memory_space<vmem>>, vector<16x32xbf16>
    %c0_1 = arith.constant 0 : index
    %c0_2 = arith.constant 0 : index
    %1 = vector.load %arg2[%c0_1, %c0_2] : memref<32x384xbf16, #tpu.memory_space<vmem>>, vector<32x384xbf16>
    %cst = arith.constant dense<0.000000e+00> : vector<16x384xf32>
    %2 = tpu.matmul %0, %1, %cst {dimension_numbers = #tpu.dot_dimension_numbers<[1], [0], [0], [1], [0, 0, 1, 1], [], []>} : vector<16x32xbf16>, vector<32x384xbf16>, vector<16x384xf32> -> vector<16x384xf32>
    %c0_3 = arith.constant 0 : index
    %c0_4 = arith.constant 0 : index
    %3 = vector.load %arg3[%c0_3, %c0_4] : memref<1x384xf32, #tpu.memory_space<vmem>>, vector<1x384xf32>
    %4 = vector.broadcast %3 : vector<1x384xf32> to vector<16x384xf32>
    %5 = arith.addf %2, %4 : vector<16x384xf32>
    %6 = vector.extract_strided_slice %5 {offsets = [0, 0], sizes = [16, 128], strides = [1, 1]} : vector<16x384xf32> to vector<16x128xf32>
    %7 = vector.shape_cast %6 : vector<16x128xf32> to vector<2x8x128xf32>
    %8 = vector.extract_strided_slice %5 {offsets = [0, 128], sizes = [16, 128], strides = [1, 1]} : vector<16x384xf32> to vector<16x128xf32>
    %9 = vector.shape_cast %8 : vector<16x128xf32> to vector<2x8x128xf32>
    %10 = vector.extract_strided_slice %5 {offsets = [0, 256], sizes = [16, 128], strides = [1, 1]} : vector<16x384xf32> to vector<16x128xf32>
    %11 = vector.shape_cast %10 : vector<16x128xf32> to vector<2x8x128xf32>
    %12 = arith.extf %0 : vector<16x32xbf16> to vector<16x32xf32>
    %13 = arith.truncf %7 : vector<2x8x128xf32> to vector<2x8x128xbf16>
    %14 = arith.truncf %9 : vector<2x8x128xf32> to vector<2x8x128xbf16>
    "tpu.trace_start"() <{level = 10 : i32, message = "bqd,bkd->bqk"}> : () -> ()
    %cst_5 = arith.constant dense<0.000000e+00> : vector<2x8x8xf32>
    %15 = tpu.matmul %13, %14, %cst_5 {dimension_numbers = #tpu.dot_dimension_numbers<[2], [2], [1], [1], [0, 0, 0, 1, 1, 1], [0], [0]>} : vector<2x8x128xbf16>, vector<2x8x128xbf16>, vector<2x8x8xf32> -> vector<2x8x8xf32>
    "tpu.trace_stop"() : () -> ()
    %cst_6 = arith.constant dense<0xFF800000> : vector<2x8xf32>
    %16 = vector.multi_reduction <maximumf>, %15, %cst_6 [2] : vector<2x8x8xf32> to vector<2x8xf32>
    %17 = vector.shape_cast %16 : vector<2x8xf32> to vector<2x8x1xf32>
    %18 = vector.broadcast %17 : vector<2x8x1xf32> to vector<2x8x8xf32>
    %19 = arith.subf %15, %18 : vector<2x8x8xf32>
    %20 = math.exp %19 : vector<2x8x8xf32>
    %cst_7 = arith.constant dense<0.000000e+00> : vector<2x8xf32>
    %21 = vector.multi_reduction <add>, %20, %cst_7 [2] : vector<2x8x8xf32> to vector<2x8xf32>
    %22 = vector.shape_cast %21 : vector<2x8xf32> to vector<2x8x1xf32>
    %23 = vector.broadcast %22 : vector<2x8x1xf32> to vector<2x8x8xf32>
    %24 = arith.divf %20, %23 : vector<2x8x8xf32>
    %25 = arith.truncf %24 : vector<2x8x8xf32> to vector<2x8x8xbf16>
    %26 = arith.truncf %11 : vector<2x8x128xf32> to vector<2x8x128xbf16>
    "tpu.trace_start"() <{level = 10 : i32, message = "bqk,bkd->bqd"}> : () -> ()
    %cst_8 = arith.constant dense<0.000000e+00> : vector<2x8x128xf32>
    %27 = tpu.matmul %25, %26, %cst_8 {dimension_numbers = #tpu.dot_dimension_numbers<[2], [1], [1], [2], [0, 0, 0, 1, 1, 2], [0], [0]>} : vector<2x8x8xbf16>, vector<2x8x128xbf16>, vector<2x8x128xf32> -> vector<2x8x128xf32>
    "tpu.trace_stop"() : () -> ()
    %28 = vector.shape_cast %27 : vector<2x8x128xf32> to vector<16x128xf32>
    %29 = arith.truncf %28 : vector<16x128xf32> to vector<16x128xbf16>
    %c0_9 = arith.constant 0 : index
    %c0_10 = arith.constant 0 : index
    %30 = vector.load %arg4[%c0_9, %c0_10] : memref<128x32xbf16, #tpu.memory_space<vmem>>, vector<128x32xbf16>
    %cst_11 = arith.constant dense<0.000000e+00> : vector<16x32xf32>
    %31 = tpu.matmul %29, %30, %cst_11 {dimension_numbers = #tpu.dot_dimension_numbers<[1], [0], [0], [1], [0, 0, 1, 1], [], []>} : vector<16x128xbf16>, vector<128x32xbf16>, vector<16x32xf32> -> vector<16x32xf32>
    %c0_12 = arith.constant 0 : index
    %c0_13 = arith.constant 0 : index
    %32 = vector.load %arg5[%c0_12, %c0_13] : memref<1x32xf32, #tpu.memory_space<vmem>>, vector<1x32xf32>
    %33 = vector.broadcast %32 : vector<1x32xf32> to vector<16x32xf32>
    %34 = arith.addf %31, %33 : vector<16x32xf32>
    %35 = arith.addf %12, %34 : vector<16x32xf32>
    %cst_14 = arith.constant dense<0.000000e+00> : vector<16xf32>
    %36 = vector.multi_reduction <add>, %35, %cst_14 [1] : vector<16x32xf32> to vector<16xf32>
    %37 = vector.shape_cast %36 : vector<16xf32> to vector<16x1xf32>
    %cst_15 = arith.constant 3.200000e+01 : f32
    %38 = vector.broadcast %cst_15 : f32 to vector<16x1xf32>
    %39 = arith.divf %37, %38 : vector<16x1xf32>
    %40 = vector.broadcast %39 : vector<16x1xf32> to vector<16x32xf32>
    %41 = arith.subf %35, %40 : vector<16x32xf32>
    %42 = arith.mulf %41, %41 : vector<16x32xf32>
    %cst_16 = arith.constant dense<0.000000e+00> : vector<16xf32>
    %43 = vector.multi_reduction <add>, %42, %cst_16 [1] : vector<16x32xf32> to vector<16xf32>
    %44 = vector.shape_cast %43 : vector<16xf32> to vector<16x1xf32>
    %cst_17 = arith.constant 3.200000e+01 : f32
    %45 = vector.broadcast %cst_17 : f32 to vector<16x1xf32>
    %46 = arith.divf %44, %45 : vector<16x1xf32>
    %47 = vector.broadcast %39 : vector<16x1xf32> to vector<16x32xf32>
    %48 = arith.subf %35, %47 : vector<16x32xf32>
    %cst_18 = arith.constant 9.99999974E-6 : f32
    %49 = vector.broadcast %cst_18 : f32 to vector<16x1xf32>
    %50 = arith.addf %46, %49 : vector<16x1xf32>
    %51 = math.rsqrt %50 : vector<16x1xf32>
    %52 = vector.broadcast %51 : vector<16x1xf32> to vector<16x32xf32>
    %53 = arith.mulf %48, %52 : vector<16x32xf32>
    %c0_19 = arith.constant 0 : index
    %c0_20 = arith.constant 0 : index
    %54 = vector.load %arg6[%c0_19, %c0_20] : memref<1x32xf32, #tpu.memory_space<vmem>>, vector<1x32xf32>
    %55 = vector.broadcast %54 : vector<1x32xf32> to vector<16x32xf32>
    %56 = arith.mulf %53, %55 : vector<16x32xf32>
    %c0_21 = arith.constant 0 : index
    %c0_22 = arith.constant 0 : index
    %57 = vector.load %arg7[%c0_21, %c0_22] : memref<1x32xf32, #tpu.memory_space<vmem>>, vector<1x32xf32>
    %58 = vector.broadcast %57 : vector<1x32xf32> to vector<16x32xf32>
    %59 = arith.addf %56, %58 : vector<16x32xf32>
    %60 = arith.truncf %59 : vector<16x32xf32> to vector<16x32xbf16>
    %c0_23 = arith.constant 0 : index
    %c0_24 = arith.constant 0 : index
    %61 = vector.load %arg8[%c0_23, %c0_24] : memref<32x128xbf16, #tpu.memory_space<vmem>>, vector<32x128xbf16>
    %cst_25 = arith.constant dense<0.000000e+00> : vector<16x128xf32>
    %62 = tpu.matmul %60, %61, %cst_25 {dimension_numbers = #tpu.dot_dimension_numbers<[1], [0], [0], [1], [0, 0, 1, 1], [], []>} : vector<16x32xbf16>, vector<32x128xbf16>, vector<16x128xf32> -> vector<16x128xf32>
    %c0_26 = arith.constant 0 : index
    %c0_27 = arith.constant 0 : index
    %63 = vector.load %arg9[%c0_26, %c0_27] : memref<1x128xf32, #tpu.memory_space<vmem>>, vector<1x128xf32>
    %64 = vector.broadcast %63 : vector<1x128xf32> to vector<16x128xf32>
    %65 = arith.addf %62, %64 : vector<16x128xf32>
    %66 = arith.mulf %65, %65 : vector<16x128xf32>
    %67 = arith.mulf %65, %66 : vector<16x128xf32>
    %cst_28 = arith.constant 4.471500e-02 : f32
    %68 = vector.broadcast %cst_28 : f32 to vector<16x128xf32>
    %69 = arith.mulf %68, %67 : vector<16x128xf32>
    %70 = arith.addf %65, %69 : vector<16x128xf32>
    %cst_29 = arith.constant 0.797884583 : f32
    %71 = vector.broadcast %cst_29 : f32 to vector<16x128xf32>
    %72 = arith.mulf %71, %70 : vector<16x128xf32>
    %73 = math.tanh %72 : vector<16x128xf32>
    %cst_30 = arith.constant 1.000000e+00 : f32
    %74 = vector.broadcast %cst_30 : f32 to vector<16x128xf32>
    %75 = arith.addf %74, %73 : vector<16x128xf32>
    %cst_31 = arith.constant 5.000000e-01 : f32
    %76 = vector.broadcast %cst_31 : f32 to vector<16x128xf32>
    %77 = arith.mulf %76, %75 : vector<16x128xf32>
    %78 = arith.mulf %65, %77 : vector<16x128xf32>
    %79 = arith.truncf %78 : vector<16x128xf32> to vector<16x128xbf16>
    %c0_32 = arith.constant 0 : index
    %c0_33 = arith.constant 0 : index
    %80 = vector.load %arg10[%c0_32, %c0_33] : memref<128x32xbf16, #tpu.memory_space<vmem>>, vector<128x32xbf16>
    %cst_34 = arith.constant dense<0.000000e+00> : vector<16x32xf32>
    %81 = tpu.matmul %79, %80, %cst_34 {dimension_numbers = #tpu.dot_dimension_numbers<[1], [0], [0], [1], [0, 0, 1, 1], [], []>} : vector<16x128xbf16>, vector<128x32xbf16>, vector<16x32xf32> -> vector<16x32xf32>
    %c0_35 = arith.constant 0 : index
    %c0_36 = arith.constant 0 : index
    %82 = vector.load %arg11[%c0_35, %c0_36] : memref<1x32xf32, #tpu.memory_space<vmem>>, vector<1x32xf32>
    %83 = vector.broadcast %82 : vector<1x32xf32> to vector<16x32xf32>
    %84 = arith.addf %81, %83 : vector<16x32xf32>
    %85 = arith.addf %59, %84 : vector<16x32xf32>
    %cst_37 = arith.constant dense<0.000000e+00> : vector<16xf32>
    %86 = vector.multi_reduction <add>, %85, %cst_37 [1] : vector<16x32xf32> to vector<16xf32>
    %87 = vector.shape_cast %86 : vector<16xf32> to vector<16x1xf32>
    %cst_38 = arith.constant 3.200000e+01 : f32
    %88 = vector.broadcast %cst_38 : f32 to vector<16x1xf32>
    %89 = arith.divf %87, %88 : vector<16x1xf32>
    %90 = vector.broadcast %89 : vector<16x1xf32> to vector<16x32xf32>
    %91 = arith.subf %85, %90 : vector<16x32xf32>
    %92 = arith.mulf %91, %91 : vector<16x32xf32>
    %cst_39 = arith.constant dense<0.000000e+00> : vector<16xf32>
    %93 = vector.multi_reduction <add>, %92, %cst_39 [1] : vector<16x32xf32> to vector<16xf32>
    %94 = vector.shape_cast %93 : vector<16xf32> to vector<16x1xf32>
    %cst_40 = arith.constant 3.200000e+01 : f32
    %95 = vector.broadcast %cst_40 : f32 to vector<16x1xf32>
    %96 = arith.divf %94, %95 : vector<16x1xf32>
    %97 = vector.broadcast %89 : vector<16x1xf32> to vector<16x32xf32>
    %98 = arith.subf %85, %97 : vector<16x32xf32>
    %cst_41 = arith.constant 9.99999974E-6 : f32
    %99 = vector.broadcast %cst_41 : f32 to vector<16x1xf32>
    %100 = arith.addf %96, %99 : vector<16x1xf32>
    %101 = math.rsqrt %100 : vector<16x1xf32>
    %102 = vector.broadcast %101 : vector<16x1xf32> to vector<16x32xf32>
    %103 = arith.mulf %98, %102 : vector<16x32xf32>
    %c0_42 = arith.constant 0 : index
    %c0_43 = arith.constant 0 : index
    %104 = vector.load %arg12[%c0_42, %c0_43] : memref<1x32xf32, #tpu.memory_space<vmem>>, vector<1x32xf32>
    %105 = vector.broadcast %104 : vector<1x32xf32> to vector<16x32xf32>
    %106 = arith.mulf %103, %105 : vector<16x32xf32>
    %c0_44 = arith.constant 0 : index
    %c0_45 = arith.constant 0 : index
    %107 = vector.load %arg13[%c0_44, %c0_45] : memref<1x32xf32, #tpu.memory_space<vmem>>, vector<1x32xf32>
    %108 = vector.broadcast %107 : vector<1x32xf32> to vector<16x32xf32>
    %109 = arith.addf %106, %108 : vector<16x32xf32>
    %110 = arith.truncf %109 : vector<16x32xf32> to vector<16x32xbf16>
    %c0_46 = arith.constant 0 : index
    %c0_47 = arith.constant 0 : index
    %111 = vector.load %arg14[%c0_46, %c0_47] : memref<32x128xbf16, #tpu.memory_space<vmem>>, vector<32x128xbf16>
    %cst_48 = arith.constant dense<0.000000e+00> : vector<16x128xf32>
    %112 = tpu.matmul %110, %111, %cst_48 {dimension_numbers = #tpu.dot_dimension_numbers<[1], [0], [0], [1], [0, 0, 1, 1], [], []>} : vector<16x32xbf16>, vector<32x128xbf16>, vector<16x128xf32> -> vector<16x128xf32>
    %c0_49 = arith.constant 0 : index
    %c0_50 = arith.constant 0 : index
    %113 = vector.load %arg15[%c0_49, %c0_50] : memref<1x128xf32, #tpu.memory_space<vmem>>, vector<1x128xf32>
    %114 = vector.broadcast %113 : vector<1x128xf32> to vector<16x128xf32>
    %115 = arith.addf %112, %114 : vector<16x128xf32>
    %c0_51 = arith.constant 0 : index
    %c0_52 = arith.constant 0 : index
    %116 = vector.load %arg16[%c0_51, %c0_52] : memref<16x128xf32, #tpu.memory_space<vmem>>, vector<16x128xf32>
    tpu.vector_store %arg16[%c0_51, %c0_52], %115 {strides = array<i32>} : memref<16x128xf32, #tpu.memory_space<vmem>>, vector<16x128xf32>,
    return
  }
}

</mosaic_0001>

<bundles_post_ra>
// kernel: _forward_impl.1
= control target key start
LH: loop header
LB: loop body
LE: loop exit
PB: predicated region body
PF: predicated region fallthrough
CT: control target
= control target key end

     0   :  { %s1420_s0 = inlined_call_operand.vmem [shape: bf16[16,32], index: 0, kind: input, shape index: {}]   ;;  %s1421_s1 = inlined_call_operand.vmem [shape: bf16[2,32], index: 1, kind: input, shape index: {}]   ;;  %s1422_s2 = inlined_call_operand.vmem [shape: bf16[32,384], index: 2, kind: input, shape index: {}]   ;;  %s1423_s3 = inlined_call_operand.vmem [shape: f32[1,384], index: 3, kind: input, shape index: {}]   ;;  %s1424_s4 = inlined_call_operand.vmem [shape: bf16[128,32], index: 4, kind: input, shape index: {}]   ;;  %s1425_s5 = inlined_call_operand.vmem [shape: f32[1,32], index: 5, kind: input, shape index: {}]   ;;  %s1426_s6 = inlined_call_operand.vmem [shape: f32[1,32], index: 6, kind: input, shape index: {}]   ;;  %s1427_s7 = inlined_call_operand.vmem [shape: f32[1,32], index: 7, kind: input, shape index: {}]   ;;  %s1428_s8 = inlined_call_operand.vmem [shape: bf16[32,128], index: 8, kind: input, shape index: {}]   ;;  %s1429_s9 = inlined_call_operand.vmem [shape: f32[1,128], index: 9, kind: input, shape index: {}]   ;;  %s1430_s10 = inlined_call_operand.vmem [shape: bf16[128,32], index: 10, kind: input, shape index: {}]   ;;  %s1431_s11 = inlined_call_operand.vmem [shape: f32[1,32], index: 11, kind: input, shape index: {}]   ;;  %s1432_s12 = inlined_call_operand.vmem [shape: f32[1,32], index: 12, kind: input, shape index: {}]   ;;  %s1433_s13 = inlined_call_operand.vmem [shape: f32[1,32], index: 13, kind: input, shape index: {}]   ;;  %s1434_s14 = inlined_call_operand.vmem [shape: bf16[32,128], index: 14, kind: input, shape index: {}]   ;;  %s1435_s15 = inlined_call_operand.vmem [shape: f32[1,128], index: 15, kind: input, shape index: {}]   ;;  %s1436_s16 = inlined_call_operand.hbm [shape: f32[16,128], index: 16, kind: output, shape index: {}]  }
   0x1   :  { %1437 = sst [smem:[#allocation5_spill]] %s1420_s0 }
   0x2   :  { %v1074_v0 = vld [vmem:[%s1422_s2 + $0x1c] ss:$12 sps:$4 sm:$0xff]   ;;  %v1076_v1 = vld [vmem:[%s1422_s2 + $0x18] ss:$12 sps:$4 sm:$0xff]   ;;  %v1146_v2 = vmov 0   ;;  %s1438_s29 = sld [smem:[#allocation5_spill]] }
   0x3   :  { %155 = vmatprep.mubr.bf16.mxu0 %v1146_v2  ;;  %135 = vmatprep.subr.bf16.mxu0 %v1074_v0  ;;  %v1077_v3 = vld [vmem:[%s1422_s2 + $0x4] ss:$12 sps:$4 sm:$0xff]   ;;  %v1079_v4 = vld [vmem:[%s1422_s2] ss:$12 sps:$4 sm:$0xff]   ;;  %v1147_v6 = vmov 0.0   ;;  %vm119_vm0 = vcmask 261120  }
   0x4   :  { %980 = vmatprep.subr.bf16.mxu1 %v1147_v6  ;;  %136 = vmatpush1.bf16.msra.mxu0 %v1076_v1  ;;  %v1081_v7 = vld [vmem:[%s1422_s2 + $0x20] ss:$12 sps:$4 sm:$0xff]  }
   0x5   :  { %137 = vmatprep.subr.bf16.mxu0 %v1077_v3  ;;  %981 = vmatpush3.bf16.msra.mxu1 %v1081_v7 }
   0x6   :  { %982 = vmatprep.subr.bf16.mxu1 %v1147_v6 }
   0x8   :  { %v1252_v5 = vld [vmem:[%s1438_s29] sm:$0xff]   ;;  %138 = vmatpush1.bf16.msra.mxu0 %v1079_v4 }
   0x9   :  { %988 = vmatprep.subr.bf16.mxu0 %v1147_v6 }
   0xb   :  { %911 = vmatmul.mubr.msk.bf16.vlgmr.msra.gmra.mxu0 %vm119_vm0, %v1252_v5 }
   0xc   :  { %21 = vsyncpa [#allocation3], 0  ;;  %v1082_v8 = vld [vmem:[%s1422_s2 + $0x8] ss:$12 sps:$4 sm:$0xff]   ;;  %vm1148_vm1 = vmmov 0   ;;  %v67_v9 = vlaneseq  ;;  %vm323_vm2 = vcmask 1043456  }
   0xd   :  { %983 = vmatpush3.bf16.msra.mxu1 %v1082_v8  ;;  %984 = vmatprep.mubr.msk.bf16.mxu1 %vm1148_vm1, %v1147_v6  ;;  %v65_v12 = vld [vmem:[%s1423_s3] sm:$0x7]  ;;  %vm293_vm3 = vcmask 64512   ;;  %v1083_v0 = vld [vmem:[%s1424_s4 + $0x38] sm:$0xff]   ;;  %v1084_v4 = vld [vmem:[%s1424_s4 + $0x30] sm:$0xff]  }
   0xe   :  { %994 = vmatprep.subr.bf16.mxu1 %v1147_v6  ;;  %990 = vmatprep.mubr.msk.bf16.mxu0 %vm1148_vm1, %v1147_v6  ;;  %v68_v10 = vshrl.u32 %v67_v9, 7  ;;  %v1085_v8 = vld [vmem:[%s1424_s4 + $0x28] sm:$0xff]   ;;  %v1086_v9 = vld [vmem:[%s1424_s4 + $0x20] sm:$0xff]  }
  0x10   :  { %985 = vmatmul.mubr.msk.bf16.vlgmr.msra.gmra.mxu1 %vm119_vm0, %v1252_v5  ;;  %v73_v11 = vsub.s32 1, %v68_v10  ;;  %v69_v14 = vsub.s32 0, %v68_v10  ;;  %v77_v28 = vsub.s32 2, %v68_v10  ;;  %v1087_v10 = vld [vmem:[%s1424_s4 + $0x18] sm:$0xff]  }
  0x11   :  { %996 = vmatprep.mubr.msk.bf16.mxu1 %vm1148_vm1, %v1147_v6 }
  0x12   :  { %v74_v13 = vrot.slane %v65_v12, %v73_v11  ;;  %v70_v18 = vrot.slane %v65_v12, %v69_v14  ;;  %v78_v29 = vrot.slane %v65_v12, %v77_v28  ;;  %v1088_v11 = vld [vmem:[%s1424_s4 + $0x10] sm:$0xff]   ;;  %v1089_v12 = vld [vmem:[%s1424_s4 + $0x8] sm:$0xff]  }
  0xcb   :  { %v157_v15 = vpop.f32.mrf.mxu0 }
  0xcc   :  { %v158_v23 = vadd.f32 %v157_v15, %v70_v18 }
  0xcd   :  { %v159_v16 = vpop.f32.mrf.mxu0 }
  0xce   :  { %v160_v17 = vadd.f32 %v159_v16, %v74_v13  ;;  %v209_v25 = vpack.c.bf16 %v158_v23, %v158_v23  ;;  %v915_v23 = vld [vmem:[%s1425_s5] ss:$0 sm:$0xff] }
  0xcf   :  { %v161_v19 = vpop.f32.mrf.mxu0 }
  0xd0   :  { %v211_v20 = vpack.c.bf16 %v160_v17, %v160_v17  ;;  %v162_v26 = vadd.f32 %v161_v19, %v70_v18  ;;  %v200_v30 = vpop.f32.mrf.mxu1 }
  0xd1   :  { %v163_v21 = vpop.f32.mrf.mxu0  ;;  %v201_v31 = vadd.f32 %v200_v30, %v78_v29 }
  0xd2   :  { %v164_v22 = vadd.f32 %v163_v21, %v74_v13  ;;  %989 = vmatpush3.bf16.xpose.msra.mxu0 %v211_v20  ;;  %v210_v27 = vpack.c.bf16 %v162_v26, %v162_v26  ;;  %v986_v32 = vpop.f32.mrf.mxu1  ;;  %v1090_v13 = vld [vmem:[%s1424_s4] sm:$0xff]  }
  0xd3   :  { %1000 = vmatprep.subr.bf16.mxu0 %v1147_v6  ;;  %v318_v33 = vpack.c.bf16 %v201_v31, %v201_v31 }
  0xd4   :  { %v212_v24 = vpack.c.bf16 %v164_v22, %v164_v22  ;;  %v203_v34 = vpop.f32.mrf.mxu1 }
  0xd5   :  { %v325_v35 = vsel %vm323_vm2, %v318_v33, 0  ;;  %v204_v36 = vadd.f32 %v203_v34, %v78_v29  ;;  %v208_v29 = vunpack.c.h.bf16 %v1252_v5 }
  0xd6   :  { %995 = vmatpush3.bf16.xpose.msra.mxu1 %v212_v24  ;;  %v987_v37 = vpop.f32.mrf.mxu1  ;;  %v207_v24 = vunpack.c.l.bf16 %v1252_v5 }
  0xd7   :  { %1006 = vmatprep.subr.bf16.mxu1 %v1147_v6  ;;  %v319_v38 = vpack.c.bf16 %v204_v36, %v204_v36 }
  0xd9   :  { %991 = vmatmul.mubr.bf16.vlgmr.msra.gmra.mxu0 %v209_v25  ;;  %v371_v39 = vsel %vm323_vm2, %v319_v38, 0 }
  0xda   :  { %1002 = vmatprep.mubr.msk.bf16.mxu0 %vm1148_vm1, %v1147_v6  ;;  %1001 = vmatpush3.bf16.msra.mxu0 %v325_v35 }
  0xdb   :  { %1012 = vmatprep.subr.bf16.mxu0 %v1147_v6 }
  0xdd   :  { %997 = vmatmul.mubr.bf16.vlgmr.msra.gmra.mxu1 %v210_v27 }
  0xde   :  { %1008 = vmatprep.mubr.msk.bf16.mxu1 %vm1148_vm1, %v1147_v6  ;;  %1007 = vmatpush3.bf16.msra.mxu1 %v371_v39 }
  0xdf   :  { %1032 = vmatprep.subr.bf16.mxu1 %v1147_v6 }
 0x199   :  { %v247_v40 = vpop.f32.mrf.mxu0 }
 0x19a   :  { %v294_v41 = vsel %vm293_vm3, %v247_v40, -inf }
 0x19b   :  { %295 = vmax.xlane.f32.xlu0 %v294_v41  ;;  %v992_v42 = vpop.f32.mrf.mxu0 }
 0x19d   :  { %v250_v43 = vpop.f32.mrf.mxu0  ;;  %v287_v44 = vpop.f32.mrf.mxu1 }
 0x19e   :  { %v297_v45 = vsel %vm293_vm3, %v287_v44, -inf }
 0x19f   :  { %v998_v46 = vpop.f32.mrf.mxu1  ;;  %298 = vmax.xlane.f32.xlu0 %v297_v45  ;;  %v993_v47 = vpop.f32.mrf.mxu0  ;;  %v1091_v45 = vld [vmem:[%s1428_s8 + $0x8] sm:$0xff]  }
 0x1a0   :  { %v1092_v46 = vld [vmem:[%s1428_s8] sm:$0xff]  }
 0x1a1   :  { %v290_v48 = vpop.f32.mrf.mxu1 }
 0x1a3   :  { %v999_v49 = vpop.f32.mrf.mxu1 }
 0x224   :  { %v296_v50 = vpop.xlane.xlu0 %295 }
 0x225   :  { %v300_v51 = vsub.f32 %v247_v40, %v296_v50 }
 0x227   :  { %v302_v52 = vmul.f32 1.442695, %v300_v51 }
 0x228   :  { %v299_v53 = vpop.xlane.xlu0 %298 }
 0x229   :  { %1104 = vpow2.f32 %v302_v52  ;;  %v301_v54 = vsub.f32 %v287_v44, %v299_v53 }
 0x22b   :  { %v304_v55 = vmul.f32 1.442695, %v301_v54 }
 0x22d   :  { %1106 = vpow2.f32 %v304_v55  ;;  %v924_v55 = vld [vmem:[%s1426_s6] ss:$0 sm:$0xff] }
 0x236   :  { %v1105_v56 = vpop.eup %1104 }
 0x237   :  { %v306_v57 = vsel %vm293_vm3, %v1105_v56, 0.0 }
 0x238   :  { %307 = vadd.xlane.f32.xlu1 %v306_v57 }
 0x23a   :  { %v1107_v58 = vpop.eup %1106 }
 0x23b   :  { %v309_v59 = vsel %vm293_vm3, %v1107_v58, 0.0 }
 0x23c   :  { %310 = vadd.xlane.f32.xlu1 %v309_v59  ;;  %v925_v59 = vld [vmem:[%s1427_s7] ss:$0 sm:$0xff] }
 0x2c1   :  { %v308_v60 = vpop.xlane.xlu1 %307 }
 0x2c2   :  { %1108 = vrcp.f32 %v308_v60 }
 0x2c5   :  { %v311_v61 = vpop.xlane.xlu1 %310 }
 0x2c6   :  { %1110 = vrcp.f32 %v311_v61 }
 0x2cf   :  { %v1109_v62 = vpop.eup %1108 }
 0x2d0   :  { %v313_v63 = vmul.f32 %v1109_v62, %v1105_v56 }
 0x2d2   :  { %v316_v1 = vpack.c.bf16 %v313_v63, %v313_v63 }
 0x2d3   :  { %v1111_v2 = vpop.eup %1110 }
 0x2d4   :  { %1003 = vmatmul.mubr.msk.bf16.vlgmr.msra.gmra.mxu0 %vm293_vm3, %v316_v1  ;;  %v315_v3 = vmul.f32 %v1111_v2, %v1107_v58  ;;  %v1094_v1 = vld [vmem:[%s1430_s10 + $0x30] sm:$0xff]   ;;  %v1095_v2 = vld [vmem:[%s1430_s10 + $0x28] sm:$0xff]  }
 0x2d5   :  { %1013 = vmatpush3.bf16.msra.mxu0 %v1083_v0  ;;  %1028 = vmatprep.mubr.msk.bf16.mxu0 %vm1148_vm1, %v1147_v6  ;;  %v1093_v0 = vld [vmem:[%s1430_s10 + $0x38] sm:$0xff]  }
 0x2d6   :  { %v317_v7 = vpack.c.bf16 %v315_v3, %v315_v3  ;;  %1014 = vmatprep.subr.bf16.mxu0 %v1147_v6  ;;  %v1096_v3 = vld [vmem:[%s1430_s10 + $0x20] sm:$0xff]  }
 0x2d8   :  { %1009 = vmatmul.mubr.msk.bf16.vlgmr.msra.gmra.mxu1 %vm293_vm3, %v317_v7  ;;  %v1098_v7 = vld [vmem:[%s1430_s10 + $0x10] sm:$0xff]  }
 0x2d9   :  { %1015 = vmatpush3.bf16.msra.mxu0 %v1084_v4  ;;  %1036 = vmatprep.mubr.msk.bf16.mxu1 %vm1148_vm1, %v1147_v6  ;;  %v1097_v4 = vld [vmem:[%s1430_s10 + $0x18] sm:$0xff]  }
 0x2da   :  { %1016 = vmatprep.subr.bf16.mxu0 %v1147_v6  ;;  %1033 = vmatpush3.bf16.msra.mxu1 %v1091_v45 }
 0x2db   :  { %1034 = vmatprep.subr.bf16.mxu1 %v1147_v6 }
 0x2dd   :  { %1017 = vmatpush3.bf16.msra.mxu0 %v1085_v8  ;;  %v1099_v8 = vld [vmem:[%s1430_s10 + $0x8] sm:$0xff]  }
 0x2de   :  { %1018 = vmatprep.subr.bf16.mxu0 %v1147_v6  ;;  %1035 = vmatpush3.bf16.msra.mxu1 %v1092_v46 }
 0x2df   :  { %1040 = vmatprep.subr.bf16.mxu1 %v1147_v6 }
 0x2e1   :  { %1019 = vmatpush3.bf16.msra.mxu0 %v1086_v9  ;;  %v1100_v9 = vld [vmem:[%s1430_s10] sm:$0xff]  }
 0x2e2   :  { %1020 = vmatprep.subr.bf16.mxu0 %v1147_v6 }
 0x2e5   :  { %1021 = vmatpush3.bf16.msra.mxu0 %v1087_v10  ;;  %v926_v10 = vld [vmem:[%s1429_s9] ss:$0 sm:$0xff] }
 0x2e6   :  { %1022 = vmatprep.subr.bf16.mxu0 %v1147_v6 }
 0x2e9   :  { %1023 = vmatpush3.bf16.msra.mxu0 %v1088_v11 }
 0x2ea   :  { %1024 = vmatprep.subr.bf16.mxu0 %v1147_v6 }
 0x2ed   :  { %1025 = vmatpush3.bf16.msra.mxu0 %v1089_v12 }
 0x2ee   :  { %1026 = vmatprep.subr.bf16.mxu0 %v1147_v6 }
 0x2f1   :  { %1027 = vmatpush3.bf16.msra.mxu0 %v1090_v13 }
 0x2f2   :  { %1060 = vmatprep.subr.bf16.mxu0 %v1147_v6 }
 0x394   :  { %v361_v14 = vpop.f32.mrf.mxu0 }
 0x396   :  { %v1004_v15 = vpop.f32.mrf.mxu0 }
 0x398   :  { %v364_v16 = vpop.f32.mrf.mxu0  ;;  %v407_v17 = vpop.f32.mrf.mxu1 }
 0x399   :  { %v413_v18 = vpack.c.bf16 %v407_v17, %v361_v14 }
 0x39a   :  { %v1005_v19 = vpop.f32.mrf.mxu0  ;;  %v1010_v20 = vpop.f32.mrf.mxu1 }
 0x39b   :  { %1029 = vmatmul.mubr.bf16.vlgmr.msra.gmra.mxu0 %v413_v18 }
 0x39c   :  { %v410_v21 = vpop.f32.mrf.mxu1  ;;  %1064 = vmatprep.mubr.msk.bf16.mxu0 %vm1148_vm1, %v1147_v6 }
 0x39e   :  { %v1011_v22 = vpop.f32.mrf.mxu1 }
 0x45b   :  { %v519_v25 = vpop.f32.mrf.mxu0 }
 0x45c   :  { %v520_v26 = vadd.f32 %v915_v23, %v519_v25 }
 0x45d   :  { %v1030_v27 = vpop.f32.mrf.mxu0 }
 0x45e   :  { %v526_v28 = vadd.f32 %v520_v26, %v207_v24 }
 0x45f   :  { %v522_v30 = vpop.f32.mrf.mxu0 }
 0x460   :  { %v523_v31 = vadd.f32 %v915_v23, %v522_v30  ;;  %v528_v32 = vsel %vm119_vm0, %v526_v28, 0.0 }
 0x461   :  { %529 = vadd.xlane.f32.xlu0 %v528_v32  ;;  %v1031_v33 = vpop.f32.mrf.mxu0 }
 0x462   :  { %v527_v34 = vadd.f32 %v523_v31, %v208_v29 }
 0x464   :  { %v531_v35 = vsel %vm119_vm0, %v527_v34, 0.0 }
 0x465   :  { %532 = vadd.xlane.f32.xlu1 %v531_v35 }
 0x4ea   :  { %v530_v36 = vpop.xlane.xlu0 %529 }
 0x4eb   :  { %v535_v37 = vmul.f32 0.03125, %v530_v36  ;;  %v930_v36 = vld [vmem:[%s1431_s11] ss:$0 sm:$0xff] }
 0x4ed   :  { %v537_v38 = vsub.f32 %v526_v28, %v535_v37 }
 0x4ee   :  { %v533_v39 = vpop.xlane.xlu1 %532 }
 0x4ef   :  { %v536_v40 = vmul.f32 0.03125, %v533_v39  ;;  %v539_v41 = vmul.f32 %v537_v38, %v537_v38 }
 0x4f1   :  { %v538_v42 = vsub.f32 %v527_v34, %v536_v40  ;;  %v541_v43 = vsel %vm119_vm0, %v539_v41, 0.0 }
 0x4f2   :  { %542 = vadd.xlane.f32.xlu0 %v541_v43 }
 0x4f3   :  { %v540_v5 = vmul.f32 %v538_v42, %v538_v42 }
 0x4f5   :  { %v544_v44 = vsel %vm119_vm0, %v540_v5, 0.0 }
 0x4f6   :  { %545 = vadd.xlane.f32.xlu1 %v544_v44 }
 0x57b   :  { %v543_v47 = vpop.xlane.xlu0 %542 }
 0x57c   :  { %v547_v48 = vmul.f32 0.03125, %v543_v47 }
 0x57e   :  { %v549_v49 = vadd.f32 1e-05, %v547_v48 }
 0x57f   :  { %v546_v50 = vpop.xlane.xlu1 %545 }
 0x580   :  { %1112 = vrsqrt.f32 %v549_v49  ;;  %v548_v51 = vmul.f32 0.03125, %v546_v50 }
 0x582   :  { %v550_v52 = vadd.f32 1e-05, %v548_v51 }
 0x584   :  { %1114 = vrsqrt.f32 %v550_v52 }
 0x58d   :  { %v1113_v53 = vpop.eup %1112 }
 0x58e   :  { %v553_v54 = vmul.f32 %v1113_v53, %v537_v38 }
 0x590   :  { %v562_v58 = vmul.f32 %v924_v55, %v553_v54 }
 0x591   :  { %v1115_v56 = vpop.eup %1114 }
 0x592   :  { %v554_v57 = vmul.f32 %v1115_v56, %v538_v42  ;;  %v571_v61 = vadd.f32 %v925_v59, %v562_v58  ;;  %v1101_v56 = vld [vmem:[%s1434_s14 + $0x8] sm:$0xff]  }
 0x593   :  { %1061 = vmatpush3.bf16.msra.mxu0 %v1101_v56 }
 0x594   :  { %v563_v60 = vmul.f32 %v924_v55, %v554_v57  ;;  %v1102_v57 = vld [vmem:[%s1434_s14] sm:$0xff]   ;;  %1062 = vmatprep.subr.bf16.mxu0 %v1147_v6 }
 0x596   :  { %v1352_v62 = vadd.f32 %v925_v59, %v563_v60 }
 0x597   :  { %1063 = vmatpush3.bf16.msra.mxu0 %v1102_v57 }
 0x598   :  { %v573_v63 = vpack.c.bf16 %v1352_v62, %v571_v61 }
 0x59a   :  { %1037 = vmatmul.mubr.msk.bf16.vlgmr.msra.gmra.mxu1 %vm119_vm0, %v573_v63 }
 0x59b   :  { %1056 = vmatprep.mubr.msk.bf16.mxu1 %vm1148_vm1, %v1147_v6  ;;  %1041 = vmatpush3.bf16.msra.mxu1 %v1093_v0 }
 0x59c   :  { %1042 = vmatprep.subr.bf16.mxu1 %v1147_v6 }
 0x59f   :  { %1043 = vmatpush3.bf16.msra.mxu1 %v1094_v1 }
 0x5a0   :  { %1044 = vmatprep.subr.bf16.mxu1 %v1147_v6 }
 0x5a3   :  { %1045 = vmatpush3.bf16.msra.mxu1 %v1095_v2  ;;  %v939_v2 = vld [vmem:[%s1432_s12] ss:$0 sm:$0xff]  ;;  %s1149_s12 = smov [#allocation2]  }
 0x5a4   :  { %1046 = vmatprep.subr.bf16.mxu1 %v1147_v6  ;;  %s893_s7 = sshll.u32 %s1149_s12, 4  ;;  %s894_s7 = int_to_ptr.vmem [resolvable:$true] %s893_s7 }
 0x5a5   :  { %p1129_p1 = scmp.lt.s32.totalorder %s894_s7, %s894_s7 }
 0x5a7   :  { %1047 = vmatpush3.bf16.msra.mxu1 %v1096_v3 }
 0x5a8   :  { %1048 = vmatprep.subr.bf16.mxu1 %v1147_v6 }
 0x5ab   :  { %1049 = vmatpush3.bf16.msra.mxu1 %v1097_v4 }
 0x5ac   :  { %1050 = vmatprep.subr.bf16.mxu1 %v1147_v6 }
 0x5af   :  { %1051 = vmatpush3.bf16.msra.mxu1 %v1098_v7 }
 0x5b0   :  { %1052 = vmatprep.subr.bf16.mxu1 %v1147_v6 }
 0x5b3   :  { %1053 = vmatpush3.bf16.msra.mxu1 %v1099_v8 }
 0x5b4   :  { %1054 = vmatprep.subr.bf16.mxu1 %v1147_v6  ;;  %v940_v6 = vld [vmem:[%s1433_s13] ss:$0 sm:$0xff]  ;;  %s1124_s13 = scalar_lea.vmem %s894_s7, 256 }
 0x5b5   :  { %p1125_p0 = scmp.ne.s32.totalorder %s894_s7, %s1124_s13  ;;  %p1130_p2 = scmp.lt.s32.totalorder %s1124_s13, %s1124_s13 }
 0x5b7   :  { %1055 = vmatpush3.bf16.msra.mxu1 %v1100_v9  ;;  %p1131_p3 = por %p1130_p2, %p1129_p1 }
 0x5b9   :  { %p1132_p4 = pnand %p1131_p3, %p1125_p0 }
 0x65a   :  { %v634_v11 = vpop.f32.mrf.mxu1 }
 0x65b   :  { %v635_v12 = vadd.f32 %v926_v10, %v634_v11 }
 0x65c   :  { %v1038_v13 = vpop.f32.mrf.mxu1 }
 0x65d   :  { %v641_v14 = vmul.f32 %v635_v12, %v635_v12 }
 0x65e   :  { %v637_v15 = vpop.f32.mrf.mxu1 }
 0x65f   :  { %v643_v16 = vmul.f32 %v641_v14, %v635_v12  ;;  %v638_v17 = vadd.f32 %v926_v10, %v637_v15 }
 0x660   :  { %v1039_v18 = vpop.f32.mrf.mxu1 }
 0x661   :  { %v645_v19 = vmul.f32 0.044715, %v643_v16  ;;  %v642_v20 = vmul.f32 %v638_v17, %v638_v17 }
 0x663   :  { %v647_v21 = vadd.f32 %v645_v19, %v635_v12  ;;  %v644_v22 = vmul.f32 %v642_v20, %v638_v17 }
 0x665   :  { %v649_v23 = vmul.f32 0.7978846, %v647_v21  ;;  %v646_v24 = vmul.f32 0.044715, %v644_v22 }
 0x667   :  { %1116 = vtanh.f32 %v649_v23  ;;  %v648_v25 = vadd.f32 %v646_v24, %v638_v17 }
 0x669   :  { %v650_v26 = vmul.f32 0.7978846, %v648_v25 }
 0x66b   :  { %1118 = vtanh.f32 %v650_v26 }
 0x674   :  { %v1117_v27 = vpop.eup %1116 }
 0x675   :  { %v653_v28 = vadd.f32 1.0, %v1117_v27 }
 0x677   :  { %v655_v30 = vmul.f32 0.5, %v653_v28 }
 0x678   :  { %v1119_v29 = vpop.eup %1118 }
 0x679   :  { %v654_v31 = vadd.f32 1.0, %v1119_v29  ;;  %v657_v33 = vmul.f32 %v655_v30, %v635_v12  ;;  %v941_v12 = vld [vmem:[%s1435_s15] ss:$0 sm:$0xff] }
 0x67b   :  { %v656_v32 = vmul.f32 0.5, %v654_v31 }
 0x67d   :  { %v658_v34 = vmul.f32 %v656_v32, %v638_v17 }
 0x67f   :  { %v659_v35 = vpack.c.bf16 %v658_v34, %v657_v33 }
 0x681   :  { %1057 = vmatmul.mubr.bf16.vlgmr.msra.gmra.mxu1 %v659_v35 }
 0x741   :  { %v765_v37 = vpop.f32.mrf.mxu1 }
 0x742   :  { %v766_v38 = vadd.f32 %v930_v36, %v765_v37 }
 0x743   :  { %v1058_v39 = vpop.f32.mrf.mxu1 }
 0x744   :  { %v772_v40 = vadd.f32 %v766_v38, %v571_v61 }
 0x745   :  { %v768_v41 = vpop.f32.mrf.mxu1 }
 0x746   :  { %v769_v42 = vadd.f32 %v930_v36, %v768_v41  ;;  %v774_v43 = vsel %vm119_vm0, %v772_v40, 0.0 }
 0x747   :  { %775 = vadd.xlane.f32.xlu0 %v774_v43  ;;  %v1059_v5 = vpop.f32.mrf.mxu1 }
 0x748   :  { %v773_v44 = vadd.f32 %v769_v42, %v1352_v62 }
 0x74a   :  { %v777_v45 = vsel %vm119_vm0, %v773_v44, 0.0 }
 0x74b   :  { %778 = vadd.xlane.f32.xlu1 %v777_v45 }
 0x7d0   :  { %v776_v46 = vpop.xlane.xlu0 %775 }
 0x7d1   :  { %v780_v47 = vmul.f32 0.03125, %v776_v46 }
 0x7d3   :  { %v782_v48 = vsub.f32 %v772_v40, %v780_v47 }
 0x7d4   :  { %v779_v49 = vpop.xlane.xlu1 %778 }
 0x7d5   :  { %v781_v50 = vmul.f32 0.03125, %v779_v49  ;;  %v784_v51 = vmul.f32 %v782_v48, %v782_v48 }
 0x7d7   :  { %v783_v52 = vsub.f32 %v773_v44, %v781_v50  ;;  %v786_v53 = vsel %vm119_vm0, %v784_v51, 0.0 }
 0x7d8   :  { %787 = vadd.xlane.f32.xlu0 %v786_v53 }
 0x7d9   :  { %v785_v54 = vmul.f32 %v783_v52, %v783_v52 }
 0x7db   :  { %v789_v55 = vsel %vm119_vm0, %v785_v54, 0.0 }
 0x7dc   :  { %790 = vadd.xlane.f32.xlu1 %v789_v55 }
 0x861   :  { %v788_v58 = vpop.xlane.xlu0 %787 }
 0x862   :  { %v792_v59 = vmul.f32 0.03125, %v788_v58 }
 0x864   :  { %v794_v60 = vadd.f32 1e-05, %v792_v59 }
 0x865   :  { %v791_v61 = vpop.xlane.xlu1 %790 }
 0x866   :  { %1120 = vrsqrt.f32 %v794_v60  ;;  %v793_v62 = vmul.f32 0.03125, %v791_v61 }
 0x868   :  { %v795_v63 = vadd.f32 1e-05, %v793_v62 }
 0x86a   :  { %1122 = vrsqrt.f32 %v795_v63 }
 0x873   :  { %v1121_v0 = vpop.eup %1120 }
 0x874   :  { %v798_v1 = vmul.f32 %v1121_v0, %v782_v48 }
 0x876   :  { %v807_v7 = vmul.f32 %v939_v2, %v798_v1 }
 0x877   :  { %v1123_v3 = vpop.eup %1122 }
 0x878   :  { %v799_v4 = vmul.f32 %v1123_v3, %v783_v52  ;;  %v816_v9 = vadd.f32 %v940_v6, %v807_v7 }
 0x87a   :  { %v808_v8 = vmul.f32 %v939_v2, %v799_v4 }
 0x87c   :  { %v817_v10 = vadd.f32 %v940_v6, %v808_v8 }
 0x87e   :  { %v818_v11 = vpack.c.bf16 %v817_v10, %v816_v9 }
 0x880   :  { %1065 = vmatmul.mubr.msk.bf16.vlgmr.msra.gmra.mxu0 %vm119_vm0, %v818_v11 }
 0x940   :  { %v879_v13 = vpop.f32.mrf.mxu0 }
 0x941   :  { %v880_v14 = vadd.f32 %v941_v12, %v879_v13 }
 0x942   :  { %v1066_v15 = vpop.f32.mrf.mxu0 }
 0x943   :  { %886 = vst [vmem:[#allocation2] sm:$0xff] %v880_v14 }
 0x944   :  { %v882_v16 = vpop.f32.mrf.mxu0 }
 0x945   :  { %v883_v17 = vadd.f32 %v941_v12, %v882_v16 }
 0x946   :  { %v1067_v18 = vpop.f32.mrf.mxu0 }
 0x947   :  { %887 = vst [vmem:[#allocation2 + $0x8] sm:$0xff] %v883_v17 }
 0x948   :  { %1135 = shalt.err (!%p1132_p4)
}
 0x949   :  { %s1150_s25 = smov 128   ;;  %s1151_s15 = smov 8  }
 0x94a   :  { %899 = dma.vmem_to_hbm [thread:$0]  %s894_s7, 256, %s1436_s16, [#allocation3], %s1150_s25, %s1150_s25, %s1151_s15  }
 0x94b   :  { %1144 = dma.done.wait [#allocation3], 256  }
 0x94c   :  { %1145 = vsyncadd [#allocation3], 4294967040 }
 0x94d   :  { %903 = vsyncpa [#allocation3], 1 }

</bundles_post_ra>
